<compile_context>
chip_gen: v7x
topology: tpu7x:2x2x1
jax: 0.10.0
libtpu: 0.0.40
codegen_flags: <defaults>
</compile_context>

<pallas_src>
import math

import jax
import jax.numpy as jnp
from jax import random
from jax.experimental import pallas as pl
from jax.experimental.pallas import tpu as pltpu

# ----------------------------- small config --------------------------------
B = 2        # batch
S = 8        # seq_len
D = 32       # d_model
DK = 16      # d_k
DV = 16      # d_v
H = 3        # n_heads
LN_EPS = 1e-3   # LayerNormalization eps (added to std, torch-style)


# ============================ fused MHA kernel ==============================
def _mha_kernel(q_ref, k_ref, v_ref, wqkv_ref, wp_ref, vec_ref, out_ref, attn_ref):
    # flatten (B,S,D) -> (B*S,D) so the projection matmuls fill more MXU rows
    qf = q_ref[...].astype(jnp.float32).reshape(B * S, D)
    kf = k_ref[...].astype(jnp.float32).reshape(B * S, D)
    vf = v_ref[...].astype(jnp.float32).reshape(B * S, D)
    wqkv = wqkv_ref[...]                                   # (D, 2*H*DK + H*DV)

    # fused per-head projections: one wide matmul per Q / K / V
    qp = jnp.dot(qf, wqkv[:, 0:H * DK],
                 preferred_element_type=jnp.float32).reshape(B, S, H * DK)
    kp = jnp.dot(kf, wqkv[:, H * DK:2 * H * DK],
                 preferred_element_type=jnp.float32).reshape(B, S, H * DK)
    vp = jnp.dot(vf, wqkv[:, 2 * H * DK:2 * H * DK + H * DV],
                 preferred_element_type=jnp.float32).reshape(B, S, H * DV)

    scale = 1.0 / math.sqrt(DK)
    heads = []
    for h in range(H):                                     # static unroll over heads
        qh = qp[:, :, h * DK:(h + 1) * DK]                 # (B, S, DK)
        kh = kp[:, :, h * DK:(h + 1) * DK]                 # (B, S, DK)
        vh = vp[:, :, h * DV:(h + 1) * DV]                 # (B, S, DV)
        att = jnp.einsum('bqd,bkd->bqk', qh, kh,
                         preferred_element_type=jnp.float32) * scale
        # TODO(synk): non-None attn_mask (masked_fill with -inf) not implemented;
        #             the reference test path uses attn_mask=None.
        att = att - jnp.max(att, axis=-1, keepdims=True)
        att = jnp.exp(att)
        att = att / jnp.sum(att, axis=-1, keepdims=True)
        # dropout on attn: eval mode -> identity
        attn_ref[pl.ds(h * B, B)] = att                    # head-major, torch layout
        heads.append(jnp.einsum('bqk,bkd->bqd', att, vh,
                                preferred_element_type=jnp.float32))

    # concat heads + single output-projection matmul
    ctx = jnp.concatenate(heads, axis=-1).reshape(B * S, H * DV)
    bp = vec_ref[0:1, :]                                   # proj bias
    gamma = vec_ref[1:2, :]                                # LN gamma
    beta = vec_ref[2:3, :]                                 # LN beta
    proj = jnp.dot(ctx, wp_ref[...], preferred_element_type=jnp.float32) + bp
    # dropout on proj output: eval mode -> identity
    z = qf + proj                                          # residual = q input

    # torch custom LayerNormalization: unbiased std (N-1), eps added to std
    mean = jnp.mean(z, axis=-1, keepdims=True)
    std = jnp.sqrt(jnp.sum((z - mean) ** 2, axis=-1, keepdims=True) / (D - 1))
    ln = gamma * ((z - mean) / (std + LN_EPS)) + beta
    out_ref[...] = ln.reshape(B, S, D)


def multi_head_attention(params, q, k, v):
    grid_spec = pltpu.PrefetchScalarGridSpec(
        num_scalar_prefetch=0,
        grid=(1,),                        # single block: whole problem fits in VMEM
        in_specs=[
            pl.BlockSpec((B, S, D), lambda i: (0, 0, 0)),
            pl.BlockSpec((B, S, D), lambda i: (0, 0, 0)),
            pl.BlockSpec((B, S, D), lambda i: (0, 0, 0)),
            pl.BlockSpec((D, 2 * H * DK + H * DV), lambda i: (0, 0)),
            pl.BlockSpec((H * DV, D), lambda i: (0, 0)),
            pl.BlockSpec((3, D), lambda i: (0, 0)),
        ],
        out_specs=[
            pl.BlockSpec((B, S, D), lambda i: (0, 0, 0)),
            pl.BlockSpec((H * B, S, S), lambda i: (0, 0, 0)),
        ],
    )
    return pl.pallas_call(
        _mha_kernel,
        out_shape=(jax.ShapeDtypeStruct((B, S, D), jnp.float32),
                   jax.ShapeDtypeStruct((H * B, S, S), jnp.float32)),
        grid_spec=grid_spec,
        compiler_params=pltpu.CompilerParams(dimension_semantics=("arbitrary",)),
    )(q, k, v, params["wqkv"], params["wp"], params["vecs"])


# ===================== deterministic parameter init ========================
def init_params(key):
    ks = random.split(key, 5)
    # xavier_normal_ style std for the per-head projection tensors
    wq = random.normal(ks[0], (H, D, DK), jnp.float32) * math.sqrt(2.0 / (D + DK))
    wk = random.normal(ks[1], (H, D, DK), jnp.float32) * math.sqrt(2.0 / (D + DK))
    wv = random.normal(ks[2], (H, D, DV), jnp.float32) * math.sqrt(2.0 / (D + DV))
    # pack per-head weights column-wise: [Wq_h0..Wq_hH | Wk_... | Wv_...]
    wq_all = jnp.concatenate([wq[h] for h in range(H)], axis=1)   # (D, H*DK)
    wk_all = jnp.concatenate([wk[h] for h in range(H)], axis=1)   # (D, H*DK)
    wv_all = jnp.concatenate([wv[h] for h in range(H)], axis=1)   # (D, H*DV)
    wqkv = jnp.concatenate([wq_all, wk_all, wv_all], axis=1)      # (D, 144)

    # output projection Linear(H*DV, D): weight stored pre-transposed (in, out)
    # TODO(synk): torch uses init.orthogonal_ here; scaled normal used for
    #             deterministic self-contained init (forward math unchanged).
    wp = random.normal(ks[3], (H * DV, D), jnp.float32) / math.sqrt(H * DV)
    bound = 1.0 / math.sqrt(H * DV)
    bp = random.uniform(ks[4], (D,), jnp.float32, minval=-bound, maxval=bound)

    gamma = jnp.ones((D,), jnp.float32)
    beta = jnp.zeros((D,), jnp.float32)
    vecs = jnp.stack([bp, gamma, beta], axis=0)                   # (3, D)
    return dict(wqkv=wqkv, wp=wp, vecs=vecs)


if __name__ == "__main__":
    key = random.PRNGKey(0)
    pkey, xkey = random.split(key)
    params = init_params(pkey)
    x = random.normal(xkey, (B, S, D), jnp.float32)

    # self-attention usage (as in the enclosing decoder): q = k = v, attn_mask=None
    out, attn = jax.jit(multi_head_attention)(params, x, x, x)
    out, attn = jax.block_until_ready((out, attn))

    assert out.shape == (B, S, D) and out.dtype == jnp.float32
    assert attn.shape == (H * B, S, S) and attn.dtype == jnp.float32
    assert bool(jnp.isfinite(out).all()) and bool(jnp.isfinite(attn).all())
    print("KERNEL_OK")
</pallas_src>

<mosaic_0001>
module attributes {stable_mosaic.version = 11 : i64} {
  func.func @_mha_kernel(%arg0: i32, %arg1: memref<2x8x32xf32, #tpu.memory_space<vmem>>, %arg2: memref<2x8x32xf32, #tpu.memory_space<vmem>>, %arg3: memref<2x8x32xf32, #tpu.memory_space<vmem>>, %arg4: memref<32x144xf32, #tpu.memory_space<vmem>>, %arg5: memref<48x32xf32, #tpu.memory_space<vmem>>, %arg6: memref<3x32xf32, #tpu.memory_space<vmem>>, %arg7: memref<2x8x32xf32, #tpu.memory_space<vmem>>, %arg8: memref<6x8x8xf32, #tpu.memory_space<vmem>>) attributes {dimension_semantics = [#tpu.dimension_semantics<arbitrary>], iteration_bounds = array<i64: 1>, scalar_prefetch = 0 : i64, scratch_operands = 0 : i64, tpu.core_type = #tpu.core_type<tc>, window_params = [{pipeline_mode = #tpu.pipeline_mode<synchronous>, transform_indices = @transform_0, window_bounds = array<i64: 2, 8, 32>}, {pipeline_mode = #tpu.pipeline_mode<synchronous>, transform_indices = @transform_1, window_bounds = array<i64: 2, 8, 32>}, {pipeline_mode = #tpu.pipeline_mode<synchronous>, transform_indices = @transform_2, window_bounds = array<i64: 2, 8, 32>}, {pipeline_mode = #tpu.pipeline_mode<synchronous>, transform_indices = @transform_3, window_bounds = array<i64: 32, 144>}, {pipeline_mode = #tpu.pipeline_mode<synchronous>, transform_indices = @transform_4, window_bounds = array<i64: 48, 32>}, {pipeline_mode = #tpu.pipeline_mode<synchronous>, transform_indices = @transform_5, window_bounds = array<i64: 3, 32>}, {pipeline_mode = #tpu.pipeline_mode<synchronous>, transform_indices = @transform_6, window_bounds = array<i64: 2, 8, 32>}, {pipeline_mode = #tpu.pipeline_mode<synchronous>, transform_indices = @transform_7, window_bounds = array<i64: 6, 8, 8>}]} {
    %c0 = arith.constant 0 : index
    %c0_0 = arith.constant 0 : index
    %c0_1 = arith.constant 0 : index
    %0 = vector.load %arg1[%c0, %c0_0, %c0_1] : memref<2x8x32xf32, #tpu.memory_space<vmem>>, vector<2x8x32xf32>
    %1 = vector.shape_cast %0 : vector<2x8x32xf32> to vector<16x32xf32>
    %c0_2 = arith.constant 0 : index
    %c0_3 = arith.constant 0 : index
    %c0_4 = arith.constant 0 : index
    %2 = vector.load %arg2[%c0_2, %c0_3, %c0_4] : memref<2x8x32xf32, #tpu.memory_space<vmem>>, vector<2x8x32xf32>
    %3 = vector.shape_cast %2 : vector<2x8x32xf32> to vector<16x32xf32>
    %c0_5 = arith.constant 0 : index
    %c0_6 = arith.constant 0 : index
    %c0_7 = arith.constant 0 : index
    %4 = vector.load %arg3[%c0_5, %c0_6, %c0_7] : memref<2x8x32xf32, #tpu.memory_space<vmem>>, vector<2x8x32xf32>
    %5 = vector.shape_cast %4 : vector<2x8x32xf32> to vector<16x32xf32>
    %c0_8 = arith.constant 0 : index
    %c0_9 = arith.constant 0 : index
    %6 = vector.load %arg4[%c0_8, %c0_9] : memref<32x144xf32, #tpu.memory_space<vmem>>, vector<32x144xf32>
    %7 = vector.extract_strided_slice %6 {offsets = [0, 0], sizes = [32, 48], strides = [1, 1]} : vector<32x144xf32> to vector<32x48xf32>
    %cst = arith.constant dense<0.000000e+00> : vector<16x48xf32>
    %8 = tpu.matmul %1, %7, %cst {dimension_numbers = #tpu.dot_dimension_numbers<[1], [0], [0], [1], [0, 0, 1, 1], [], []>} : vector<16x32xf32>, vector<32x48xf32>, vector<16x48xf32> -> vector<16x48xf32>
    %9 = vector.shape_cast %8 : vector<16x48xf32> to vector<2x8x48xf32>
    %10 = vector.extract_strided_slice %6 {offsets = [0, 48], sizes = [32, 48], strides = [1, 1]} : vector<32x144xf32> to vector<32x48xf32>
    %cst_10 = arith.constant dense<0.000000e+00> : vector<16x48xf32>
    %11 = tpu.matmul %3, %10, %cst_10 {dimension_numbers = #tpu.dot_dimension_numbers<[1], [0], [0], [1], [0, 0, 1, 1], [], []>} : vector<16x32xf32>, vector<32x48xf32>, vector<16x48xf32> -> vector<16x48xf32>
    %12 = vector.shape_cast %11 : vector<16x48xf32> to vector<2x8x48xf32>
    %13 = vector.extract_strided_slice %6 {offsets = [0, 96], sizes = [32, 48], strides = [1, 1]} : vector<32x144xf32> to vector<32x48xf32>
    %cst_11 = arith.constant dense<0.000000e+00> : vector<16x48xf32>
    %14 = tpu.matmul %5, %13, %cst_11 {dimension_numbers = #tpu.dot_dimension_numbers<[1], [0], [0], [1], [0, 0, 1, 1], [], []>} : vector<16x32xf32>, vector<32x48xf32>, vector<16x48xf32> -> vector<16x48xf32>
    %15 = vector.shape_cast %14 : vector<16x48xf32> to vector<2x8x48xf32>
    %16 = vector.extract_strided_slice %9 {offsets = [0, 0, 0], sizes = [2, 8, 16], strides = [1, 1, 1]} : vector<2x8x48xf32> to vector<2x8x16xf32>
    %17 = vector.extract_strided_slice %12 {offsets = [0, 0, 0], sizes = [2, 8, 16], strides = [1, 1, 1]} : vector<2x8x48xf32> to vector<2x8x16xf32>
    %18 = vector.extract_strided_slice %15 {offsets = [0, 0, 0], sizes = [2, 8, 16], strides = [1, 1, 1]} : vector<2x8x48xf32> to vector<2x8x16xf32>
    "tpu.trace_start"() <{level = 10 : i32, message = "bqd,bkd->bqk"}> : () -> ()
    %cst_12 = arith.constant dense<0.000000e+00> : vector<2x8x8xf32>
    %19 = tpu.matmul %16, %17, %cst_12 {dimension_numbers = #tpu.dot_dimension_numbers<[2], [2], [1], [1], [0, 0, 0, 1, 1, 1], [0], [0]>} : vector<2x8x16xf32>, vector<2x8x16xf32>, vector<2x8x8xf32> -> vector<2x8x8xf32>
    "tpu.trace_stop"() : () -> ()
    %cst_13 = arith.constant 2.500000e-01 : f32
    %20 = vector.broadcast %cst_13 : f32 to vector<2x8x8xf32>
    %21 = arith.mulf %19, %20 : vector<2x8x8xf32>
    %cst_14 = arith.constant dense<0xFF800000> : vector<2x8xf32>
    %22 = vector.multi_reduction <maximumf>, %21, %cst_14 [2] : vector<2x8x8xf32> to vector<2x8xf32>
    %23 = vector.shape_cast %22 : vector<2x8xf32> to vector<2x8x1xf32>
    %24 = vector.broadcast %23 : vector<2x8x1xf32> to vector<2x8x8xf32>
    %25 = arith.subf %21, %24 : vector<2x8x8xf32>
    %26 = math.exp %25 : vector<2x8x8xf32>
    %cst_15 = arith.constant dense<0.000000e+00> : vector<2x8xf32>
    %27 = vector.multi_reduction <add>, %26, %cst_15 [2] : vector<2x8x8xf32> to vector<2x8xf32>
    %28 = vector.shape_cast %27 : vector<2x8xf32> to vector<2x8x1xf32>
    %29 = vector.broadcast %28 : vector<2x8x1xf32> to vector<2x8x8xf32>
    %30 = arith.divf %26, %29 : vector<2x8x8xf32>
    %c0_16 = arith.constant 0 : index
    %c0_17 = arith.constant 0 : index
    %c0_18 = arith.constant 0 : index
    %31 = vector.load %arg8[%c0_16, %c0_17, %c0_18] : memref<6x8x8xf32, #tpu.memory_space<vmem>>, vector<2x8x8xf32>
    tpu.vector_store %arg8[%c0_16, %c0_17, %c0_18], %30 {strides = array<i32>} : memref<6x8x8xf32, #tpu.memory_space<vmem>>, vector<2x8x8xf32>,
    "tpu.trace_start"() <{level = 10 : i32, message = "bqk,bkd->bqd"}> : () -> ()
    %cst_19 = arith.constant dense<0.000000e+00> : vector<2x8x16xf32>
    %32 = tpu.matmul %30, %18, %cst_19 {dimension_numbers = #tpu.dot_dimension_numbers<[2], [1], [1], [2], [0, 0, 0, 1, 1, 2], [0], [0]>} : vector<2x8x8xf32>, vector<2x8x16xf32>, vector<2x8x16xf32> -> vector<2x8x16xf32>
    "tpu.trace_stop"() : () -> ()
    %33 = vector.extract_strided_slice %9 {offsets = [0, 0, 16], sizes = [2, 8, 16], strides = [1, 1, 1]} : vector<2x8x48xf32> to vector<2x8x16xf32>
    %34 = vector.extract_strided_slice %12 {offsets = [0, 0, 16], sizes = [2, 8, 16], strides = [1, 1, 1]} : vector<2x8x48xf32> to vector<2x8x16xf32>
    %35 = vector.extract_strided_slice %15 {offsets = [0, 0, 16], sizes = [2, 8, 16], strides = [1, 1, 1]} : vector<2x8x48xf32> to vector<2x8x16xf32>
    "tpu.trace_start"() <{level = 10 : i32, message = "bqd,bkd->bqk"}> : () -> ()
    %cst_20 = arith.constant dense<0.000000e+00> : vector<2x8x8xf32>
    %36 = tpu.matmul %33, %34, %cst_20 {dimension_numbers = #tpu.dot_dimension_numbers<[2], [2], [1], [1], [0, 0, 0, 1, 1, 1], [0], [0]>} : vector<2x8x16xf32>, vector<2x8x16xf32>, vector<2x8x8xf32> -> vector<2x8x8xf32>
    "tpu.trace_stop"() : () -> ()
    %cst_21 = arith.constant 2.500000e-01 : f32
    %37 = vector.broadcast %cst_21 : f32 to vector<2x8x8xf32>
    %38 = arith.mulf %36, %37 : vector<2x8x8xf32>
    %cst_22 = arith.constant dense<0xFF800000> : vector<2x8xf32>
    %39 = vector.multi_reduction <maximumf>, %38, %cst_22 [2] : vector<2x8x8xf32> to vector<2x8xf32>
    %40 = vector.shape_cast %39 : vector<2x8xf32> to vector<2x8x1xf32>
    %41 = vector.broadcast %40 : vector<2x8x1xf32> to vector<2x8x8xf32>
    %42 = arith.subf %38, %41 : vector<2x8x8xf32>
    %43 = math.exp %42 : vector<2x8x8xf32>
    %cst_23 = arith.constant dense<0.000000e+00> : vector<2x8xf32>
    %44 = vector.multi_reduction <add>, %43, %cst_23 [2] : vector<2x8x8xf32> to vector<2x8xf32>
    %45 = vector.shape_cast %44 : vector<2x8xf32> to vector<2x8x1xf32>
    %46 = vector.broadcast %45 : vector<2x8x1xf32> to vector<2x8x8xf32>
    %47 = arith.divf %43, %46 : vector<2x8x8xf32>
    %c2 = arith.constant 2 : index
    %c0_24 = arith.constant 0 : index
    %c0_25 = arith.constant 0 : index
    %48 = vector.load %arg8[%c2, %c0_24, %c0_25] : memref<6x8x8xf32, #tpu.memory_space<vmem>>, vector<2x8x8xf32>
    tpu.vector_store %arg8[%c2, %c0_24, %c0_25], %47 {strides = array<i32>} : memref<6x8x8xf32, #tpu.memory_space<vmem>>, vector<2x8x8xf32>,
    "tpu.trace_start"() <{level = 10 : i32, message = "bqk,bkd->bqd"}> : () -> ()
    %cst_26 = arith.constant dense<0.000000e+00> : vector<2x8x16xf32>
    %49 = tpu.matmul %47, %35, %cst_26 {dimension_numbers = #tpu.dot_dimension_numbers<[2], [1], [1], [2], [0, 0, 0, 1, 1, 2], [0], [0]>} : vector<2x8x8xf32>, vector<2x8x16xf32>, vector<2x8x16xf32> -> vector<2x8x16xf32>
    "tpu.trace_stop"() : () -> ()
    %50 = vector.extract_strided_slice %9 {offsets = [0, 0, 32], sizes = [2, 8, 16], strides = [1, 1, 1]} : vector<2x8x48xf32> to vector<2x8x16xf32>
    %51 = vector.extract_strided_slice %12 {offsets = [0, 0, 32], sizes = [2, 8, 16], strides = [1, 1, 1]} : vector<2x8x48xf32> to vector<2x8x16xf32>
    %52 = vector.extract_strided_slice %15 {offsets = [0, 0, 32], sizes = [2, 8, 16], strides = [1, 1, 1]} : vector<2x8x48xf32> to vector<2x8x16xf32>
    "tpu.trace_start"() <{level = 10 : i32, message = "bqd,bkd->bqk"}> : () -> ()
    %cst_27 = arith.constant dense<0.000000e+00> : vector<2x8x8xf32>
    %53 = tpu.matmul %50, %51, %cst_27 {dimension_numbers = #tpu.dot_dimension_numbers<[2], [2], [1], [1], [0, 0, 0, 1, 1, 1], [0], [0]>} : vector<2x8x16xf32>, vector<2x8x16xf32>, vector<2x8x8xf32> -> vector<2x8x8xf32>
    "tpu.trace_stop"() : () -> ()
    %cst_28 = arith.constant 2.500000e-01 : f32
    %54 = vector.broadcast %cst_28 : f32 to vector<2x8x8xf32>
    %55 = arith.mulf %53, %54 : vector<2x8x8xf32>
    %cst_29 = arith.constant dense<0xFF800000> : vector<2x8xf32>
    %56 = vector.multi_reduction <maximumf>, %55, %cst_29 [2] : vector<2x8x8xf32> to vector<2x8xf32>
    %57 = vector.shape_cast %56 : vector<2x8xf32> to vector<2x8x1xf32>
    %58 = vector.broadcast %57 : vector<2x8x1xf32> to vector<2x8x8xf32>
    %59 = arith.subf %55, %58 : vector<2x8x8xf32>
    %60 = math.exp %59 : vector<2x8x8xf32>
    %cst_30 = arith.constant dense<0.000000e+00> : vector<2x8xf32>
    %61 = vector.multi_reduction <add>, %60, %cst_30 [2] : vector<2x8x8xf32> to vector<2x8xf32>
    %62 = vector.shape_cast %61 : vector<2x8xf32> to vector<2x8x1xf32>
    %63 = vector.broadcast %62 : vector<2x8x1xf32> to vector<2x8x8xf32>
    %64 = arith.divf %60, %63 : vector<2x8x8xf32>
    %c4 = arith.constant 4 : index
    %c0_31 = arith.constant 0 : index
    %c0_32 = arith.constant 0 : index
    %65 = vector.load %arg8[%c4, %c0_31, %c0_32] : memref<6x8x8xf32, #tpu.memory_space<vmem>>, vector<2x8x8xf32>
    tpu.vector_store %arg8[%c4, %c0_31, %c0_32], %64 {strides = array<i32>} : memref<6x8x8xf32, #tpu.memory_space<vmem>>, vector<2x8x8xf32>,
    "tpu.trace_start"() <{level = 10 : i32, message = "bqk,bkd->bqd"}> : () -> ()
    %cst_33 = arith.constant dense<0.000000e+00> : vector<2x8x16xf32>
    %66 = tpu.matmul %64, %52, %cst_33 {dimension_numbers = #tpu.dot_dimension_numbers<[2], [1], [1], [2], [0, 0, 0, 1, 1, 2], [0], [0]>} : vector<2x8x8xf32>, vector<2x8x16xf32>, vector<2x8x16xf32> -> vector<2x8x16xf32>
    "tpu.trace_stop"() : () -> ()
    %67 = tpu.concatenate %32, %49, %66 in 2 : vector<2x8x16xf32>, vector<2x8x16xf32>, vector<2x8x16xf32> -> vector<2x8x48xf32>
    %68 = vector.shape_cast %67 : vector<2x8x48xf32> to vector<16x48xf32>
    %c0_34 = arith.constant 0 : index
    %c0_35 = arith.constant 0 : index
    %69 = vector.load %arg6[%c0_34, %c0_35] : memref<3x32xf32, #tpu.memory_space<vmem>>, vector<1x32xf32>
    %c1 = arith.constant 1 : index
    %c0_36 = arith.constant 0 : index
    %70 = vector.load %arg6[%c1, %c0_36] : memref<3x32xf32, #tpu.memory_space<vmem>>, vector<1x32xf32>
    %c2_37 = arith.constant 2 : index
    %c0_38 = arith.constant 0 : index
    %71 = vector.load %arg6[%c2_37, %c0_38] : memref<3x32xf32, #tpu.memory_space<vmem>>, vector<1x32xf32>
    %c0_39 = arith.constant 0 : index
    %c0_40 = arith.constant 0 : index
    %72 = vector.load %arg5[%c0_39, %c0_40] : memref<48x32xf32, #tpu.memory_space<vmem>>, vector<48x32xf32>
    %cst_41 = arith.constant dense<0.000000e+00> : vector<16x32xf32>
    %73 = tpu.matmul %68, %72, %cst_41 {dimension_numbers = #tpu.dot_dimension_numbers<[1], [0], [0], [1], [0, 0, 1, 1], [], []>} : vector<16x48xf32>, vector<48x32xf32>, vector<16x32xf32> -> vector<16x32xf32>
    %74 = vector.broadcast %69 : vector<1x32xf32> to vector<16x32xf32>
    %75 = arith.addf %73, %74 : vector<16x32xf32>
    %76 = arith.addf %1, %75 : vector<16x32xf32>
    %cst_42 = arith.constant dense<0.000000e+00> : vector<16xf32>
    %77 = vector.multi_reduction <add>, %76, %cst_42 [1] : vector<16x32xf32> to vector<16xf32>
    %78 = vector.shape_cast %77 : vector<16xf32> to vector<16x1xf32>
    %cst_43 = arith.constant 3.200000e+01 : f32
    %79 = vector.broadcast %cst_43 : f32 to vector<16x1xf32>
    %80 = arith.divf %78, %79 : vector<16x1xf32>
    %81 = vector.broadcast %80 : vector<16x1xf32> to vector<16x32xf32>
    %82 = arith.subf %76, %81 : vector<16x32xf32>
    %83 = arith.mulf %82, %82 : vector<16x32xf32>
    %cst_44 = arith.constant dense<0.000000e+00> : vector<16xf32>
    %84 = vector.multi_reduction <add>, %83, %cst_44 [1] : vector<16x32xf32> to vector<16xf32>
    %85 = vector.shape_cast %84 : vector<16xf32> to vector<16x1xf32>
    %cst_45 = arith.constant 3.100000e+01 : f32
    %86 = vector.broadcast %cst_45 : f32 to vector<16x1xf32>
    %87 = arith.divf %85, %86 : vector<16x1xf32>
    %88 = math.sqrt %87 : vector<16x1xf32>
    %89 = vector.broadcast %80 : vector<16x1xf32> to vector<16x32xf32>
    %90 = arith.subf %76, %89 : vector<16x32xf32>
    %cst_46 = arith.constant 1.000000e-03 : f32
    %91 = vector.broadcast %cst_46 : f32 to vector<16x1xf32>
    %92 = arith.addf %88, %91 : vector<16x1xf32>
    %93 = vector.broadcast %92 : vector<16x1xf32> to vector<16x32xf32>
    %94 = arith.divf %90, %93 : vector<16x32xf32>
    %95 = vector.broadcast %70 : vector<1x32xf32> to vector<16x32xf32>
    %96 = arith.mulf %95, %94 : vector<16x32xf32>
    %97 = vector.broadcast %71 : vector<1x32xf32> to vector<16x32xf32>
    %98 = arith.addf %96, %97 : vector<16x32xf32>
    %99 = vector.shape_cast %98 : vector<16x32xf32> to vector<2x8x32xf32>
    %c0_47 = arith.constant 0 : index
    %c0_48 = arith.constant 0 : index
    %c0_49 = arith.constant 0 : index
    %100 = vector.load %arg7[%c0_47, %c0_48, %c0_49] : memref<2x8x32xf32, #tpu.memory_space<vmem>>, vector<2x8x32xf32>
    tpu.vector_store %arg7[%c0_47, %c0_48, %c0_49], %99 {strides = array<i32>} : memref<2x8x32xf32, #tpu.memory_space<vmem>>, vector<2x8x32xf32>,
    return
  }
  func.func @transform_0(%arg0: i32) -> (i32, i32, i32) {
    %c0_i32 = arith.constant 0 : i32
    %c0_i32_0 = arith.constant 0 : i32
    %c0_i32_1 = arith.constant 0 : i32
    %c0_i32_2 = arith.constant 0 : i32
    return %c0_i32, %c0_i32_0, %c0_i32_1 : i32, i32, i32
  }
  func.func @transform_1(%arg0: i32) -> (i32, i32, i32) {
    %c0_i32 = arith.constant 0 : i32
    %c0_i32_0 = arith.constant 0 : i32
    %c0_i32_1 = arith.constant 0 : i32
    %c0_i32_2 = arith.constant 0 : i32
    return %c0_i32, %c0_i32_0, %c0_i32_1 : i32, i32, i32
  }
  func.func @transform_2(%arg0: i32) -> (i32, i32, i32) {
    %c0_i32 = arith.constant 0 : i32
    %c0_i32_0 = arith.constant 0 : i32
    %c0_i32_1 = arith.constant 0 : i32
    %c0_i32_2 = arith.constant 0 : i32
    return %c0_i32, %c0_i32_0, %c0_i32_1 : i32, i32, i32
  }
  func.func @transform_3(%arg0: i32) -> (i32, i32) {
    %c0_i32 = arith.constant 0 : i32
    %c0_i32_0 = arith.constant 0 : i32
    %c0_i32_1 = arith.constant 0 : i32
    return %c0_i32, %c0_i32_0 : i32, i32
  }
  func.func @transform_4(%arg0: i32) -> (i32, i32) {
    %c0_i32 = arith.constant 0 : i32
    %c0_i32_0 = arith.constant 0 : i32
    %c0_i32_1 = arith.constant 0 : i32
    return %c0_i32, %c0_i32_0 : i32, i32
  }
  func.func @transform_5(%arg0: i32) -> (i32, i32) {
    %c0_i32 = arith.constant 0 : i32
    %c0_i32_0 = arith.constant 0 : i32
    %c0_i32_1 = arith.constant 0 : i32
    return %c0_i32, %c0_i32_0 : i32, i32
  }
  func.func @transform_6(%arg0: i32) -> (i32, i32, i32) {
    %c0_i32 = arith.constant 0 : i32
    %c0_i32_0 = arith.constant 0 : i32
    %c0_i32_1 = arith.constant 0 : i32
    %c0_i32_2 = arith.constant 0 : i32
    return %c0_i32, %c0_i32_0, %c0_i32_1 : i32, i32, i32
  }
  func.func @transform_7(%arg0: i32) -> (i32, i32, i32) {
    %c0_i32 = arith.constant 0 : i32
    %c0_i32_0 = arith.constant 0 : i32
    %c0_i32_1 = arith.constant 0 : i32
    %c0_i32_2 = arith.constant 0 : i32
    return %c0_i32, %c0_i32_0, %c0_i32_1 : i32, i32, i32
  }
}

</mosaic_0001>

<bundles_post_ra>
// kernel: multi_head_attention.1
= control target key start
LH: loop header
LB: loop body
LE: loop exit
PB: predicated region body
PF: predicated region fallthrough
CT: control target
= control target key end

     0   :  { %13 = vsyncpa [#allocation3], 0  ;;  %s2272_s0 = inlined_call_operand.vmem [shape: f32[2,8,32], index: 0, kind: input, shape index: {}]   ;;  %s2273_s1 = inlined_call_operand.hbm [shape: f32[2,8,32], index: 1, kind: input, shape index: {}]   ;;  %s2274_s2 = inlined_call_operand.vmem [shape: f32[2,8,32], index: 2, kind: input, shape index: {}]   ;;  %s2275_s3 = inlined_call_operand.vmem [shape: f32[32,144], index: 3, kind: input, shape index: {}]   ;;  %s2276_s4 = inlined_call_operand.vmem [shape: f32[48,32], index: 4, kind: input, shape index: {}]   ;;  %s2277_s5 = inlined_call_operand.hbm [shape: f32[3,32], index: 5, kind: input, shape index: {}]   ;;  %s2278_s6 = inlined_call_operand.hbm [shape: f32[2,8,32], index: 6, kind: output, shape index: {0}]   ;;  %s2279_s7 = inlined_call_operand.hbm [shape: f32[6,8,8], index: 7, kind: output, shape index: {1}]  }
   0x1   :  { %14 = vsyncpa [#allocation6], 0 }
   0x2   :  { %15 = vsyncpa [#allocation4], 0 }
   0x3   :  { %16 = vsyncpa [#allocation9], 0  ;;  %s1954_s24 = smov [#allocation2]   ;;  %s1858_s28 = scalar_lea.hbm %s2273_s1, 256 }
   0x4   :  { %s24_s25 = sshll.u32 %s1954_s24, 4  ;;  %p1859_p0 = scmp.ne.s32.totalorder %s2273_s1, %s1858_s28  ;;  %s25_s25 = int_to_ptr.vmem [resolvable:$true] %s24_s25 }
   0x5   :  { %p1862_p1 = scmp.lt.u32.totalorder %s1858_s28, %s2273_s1 }
   0x7   :  { %p1864_p2 = pnand %p1862_p1, %p1859_p0 }
   0x9   :  { %1867 = shalt.err (!%p1864_p2)
}
   0xa   :  { %s1868_s10 = scalar_lea.vmem %s25_s25, 256  ;;  %p1873_p4 = scmp.lt.s32.totalorder %s25_s25, %s25_s25 }
   0xb   :  { %p1869_p3 = scmp.ne.s32.totalorder %s25_s25, %s1868_s10  ;;  %p1874_p5 = scmp.lt.s32.totalorder %s1868_s10, %s1868_s10 }
   0xd   :  { %p1875_p6 = por %p1874_p5, %p1873_p4 }
   0xf   :  { %p1876_p7 = pnand %p1875_p6, %p1869_p3 }
  0x11   :  { %1879 = shalt.err (!%p1876_p7)
}
  0x12   :  { %s1955_s11 = smov 128   ;;  %s1956_s12 = smov 8  }
  0x13   :  { %30 = dma.hbm_to_vmem [thread:$0]  %s2273_s1, 256, %s25_s25, [#allocation3], %s1955_s11, %s1955_s11, %s1956_s12  }
  0x14   :  { %s1957_s15 = smov [#allocation5]   ;;  %s1880_s19 = scalar_lea.hbm %s2277_s5, 64 }
  0x15   :  { %s43_s16 = sshll.u32 %s1957_s15, 4  ;;  %p1881_p8 = scmp.ne.s32.totalorder %s2277_s5, %s1880_s19  ;;  %s44_s16 = int_to_ptr.vmem [resolvable:$true] %s43_s16 }
  0x16   :  { %p1884_p9 = scmp.lt.u32.totalorder %s1880_s19, %s2277_s5 }
  0x18   :  { %p1886_p10 = pnand %p1884_p9, %p1881_p8 }
  0x1a   :  { %1889 = shalt.err (!%p1886_p10)
}
  0x1b   :  { %s1890_s24 = scalar_lea.vmem %s44_s16, 64  ;;  %p1895_p12 = scmp.lt.s32.totalorder %s44_s16, %s44_s16 }
  0x1c   :  { %p1891_p11 = scmp.ne.s32.totalorder %s44_s16, %s1890_s24  ;;  %p1896_p13 = scmp.lt.s32.totalorder %s1890_s24, %s1890_s24 }
  0x1e   :  { %p1897_p0 = por %p1896_p13, %p1895_p12 }
  0x20   :  { %p1898_p1 = pnand %p1897_p0, %p1891_p11 }
  0x22   :  { %1901 = shalt.err (!%p1898_p1)
}
  0x23   :  { %46 = dma.hbm_to_vmem [thread:$0]  %s2277_s5, 64, %s44_s16, [#allocation6]  }
  0x24   :  { %1946 = dma.done.wait [#allocation3], 256  }
  0x25   :  { %1947 = vsyncadd [#allocation3], 4294967040 }
  0x26   :  { %1948 = dma.done.wait [#allocation6], 64  }
  0x27   :  { %1949 = vsyncadd [#allocation6], 4294967232  ;;  %vm67_vm0 = vcmask 261120   ;;  %v59_v0 = vld [vmem:[%s2275_s3] sm:$0xff]  ;;  %v61_v1 = vld [vmem:[%s2275_s3 + $0x10] sm:$0xff]  ;;  %s1958_s14 = smov 80  }
  0x28   :  { %v63_v2 = vld [vmem:[%s2275_s3 + $0x20] sm:$0xff]  ;;  %v1796_v3 = vpack.i.bf16 %v61_v1, %v59_v0  ;;  %v65_v4 = vld [vmem:[%s2275_s3 + $0x30] sm:$0xff]  ;;  %v1747_v5 = vpack.c.bf16 %v61_v1, %v59_v0  ;;  %v2056_v9 = vld [vmem:[%s2272_s0 + $0x8] sm:$0xff]  ;;  %v1959_v20 = vmov 0.0   ;;  %vm1960_vm1 = vmmov 0   ;;  %s1961_s22 = smov 32  }
  0x29   :  { %v2049_v6 = vld [vmem:[%s2272_s0] sm:$0xff]  ;;  %v1751_v7 = vpack.c.bf16 %v65_v4, %v63_v2  ;;  %v1801_v8 = vpack.i.bf16 %v65_v4, %v63_v2  ;;  %v56_v19 = vld [vmem:[#allocation2 + $0x8] sm:$0xff]  ;;  %v62_v23 = vld [vmem:[%s2275_s3 + $0x18] sm:$0xff]  ;;  %vm355_vm2 = vcmask 130048   ;;  %vm510_vm3 = vcmask 64512   ;;  %s1963_s27 = smov 96  }
  0x2a   :  { %1647 = vmatprep.mubr.msk.f32.mxu1 %vm67_vm0, %v2049_v6  ;;  %1797 = vrot.lane.b32.xlu0 %v1796_v3, %s1958_s14  ;;  %v55_v10 = vld [vmem:[#allocation2] sm:$0xff]  ;;  %v60_v22 = vld [vmem:[%s2275_s3 + $0x8] sm:$0xff]  ;;  %v1811_v28 = vpack.i.bf16 %v62_v23, %v61_v1  ;;  %v66_v29 = vld [vmem:[%s2275_s3 + $0x38] sm:$0xff]  ;;  %s1964_s28 = smov 16   ;;  %vm1386_vm4 = vcmask 392192  }
  0x2b   :  { %1748 = vmatprep.subr.bf16.mxu1 %v1747_v5  ;;  %v1806_v25 = vpack.i.bf16 %v60_v22, %v59_v0  ;;  %v64_v26 = vld [vmem:[%s2275_s3 + $0x28] sm:$0xff]  ;;  %v1821_v30 = vpack.i.bf16 %v66_v29, %v65_v4  ;;  %v57_v34 = vld [vmem:[%s2274_s2] sm:$0xff] }
  0x2c   :  { %1750 = vmatpush3.bf16.msra.mxu1 %v1747_v5  ;;  %v1816_v27 = vpack.i.bf16 %v64_v26, %v63_v2  ;;  %1669 = vmatprep.mubr.msk.f32.mxu0 %vm67_vm0, %v57_v34  ;;  %v58_v52 = vld [vmem:[%s2274_s2 + $0x8] sm:$0xff]  ;;  %s1962_s2 = smov 112  }
  0x2d   :  { %1752 = vmatprep.subr.bf16.mxu1 %v1751_v7  ;;  %1807 = vrot.lane.b32.xlu1 %v1806_v25, %s1961_s22 }
  0x2e   :  { %1802 = vrot.lane.b32.xlu0 %v1801_v8, %s1958_s14 }
  0x30   :  { %1754 = vmatpush3.bf16.msra.mxu1 %v1751_v7 }
  0x31   :  { %1812 = vrot.lane.b32.xlu1 %v1811_v28, %s1961_s22 }
  0x32   :  { %1817 = vrot.lane.b32.xlu0 %v1816_v27, %s1961_s22 }
  0x33   :  { %1648 = vmatmul.mubr.msk.f32.vlgmr.msra.gmra.mrb[0].mxu1 %vm67_vm0, %v2056_v9 }
  0x34   :  { %1658 = vmatprep.mubr.msk.f32.mxu1 %vm67_vm0, %v55_v10 }
  0x35   :  { %1822 = vrot.lane.b32.xlu1 %v1821_v30, %s1961_s22 }
  0x9c   :  { %v1798_v11 = vpop.permute.xlu0 %1797 }
  0x9d   :  { %v1800_v12 = vunpack.i.h.bf16 %v1798_v11  ;;  %v1799_v13 = vunpack.i.l.bf16 %v1798_v11 }
  0x9f   :  { %v1755_v14 = vpack.c.bf16 %v1800_v12, %v1799_v13  ;;  %v1808_v33 = vpop.permute.xlu1 %1807 }
  0xa0   :  { %v1803_v15 = vpop.permute.xlu0 %1802  ;;  %v1810_v35 = vunpack.i.h.bf16 %v1808_v33  ;;  %v1809_v36 = vunpack.i.l.bf16 %v1808_v33 }
  0xa1   :  { %v1805_v16 = vunpack.i.h.bf16 %v1803_v15  ;;  %v1804_v17 = vunpack.i.l.bf16 %v1803_v15  ;;  %1756 = vmatprep.subr.bf16.mxu1 %v1755_v14 }
  0xa2   :  { %1758 = vmatpush3.bf16.msra.mxu1 %v1755_v14  ;;  %v266_v42 = vsel %vm67_vm0, %v1809_v36, %v1810_v35 }
  0xa3   :  { %v1759_v18 = vpack.c.bf16 %v1805_v16, %v1804_v17  ;;  %v1813_v38 = vpop.permute.xlu1 %1812 }
  0xa4   :  { %v1818_v37 = vpop.permute.xlu0 %1817  ;;  %v1815_v40 = vunpack.i.h.bf16 %v1813_v38  ;;  %v1814_v41 = vunpack.i.l.bf16 %v1813_v38 }
  0xa5   :  { %1760 = vmatprep.subr.bf16.mxu1 %v1759_v18  ;;  %v1820_v39 = vunpack.i.h.bf16 %v1818_v37  ;;  %v1819_v43 = vunpack.i.l.bf16 %v1818_v37 }
  0xa6   :  { %1762 = vmatpush3.bf16.msra.mxu1 %v1759_v18  ;;  %v267_v44 = vsel %vm67_vm0, %v1814_v41, %v1815_v40 }
  0xa7   :  { %1672 = vmatprep.subr.mxu1 %v1959_v20  ;;  %v1763_v45 = vpack.c.bf16 %v267_v44, %v266_v42  ;;  %v1823_v46 = vpop.permute.xlu1 %1822  ;;  %v268_v49 = vsel %vm67_vm0, %v1819_v43, %v1820_v39 }
  0xa8   :  { %v1825_v47 = vunpack.i.h.bf16 %v1823_v46  ;;  %v1824_v48 = vunpack.i.l.bf16 %v1823_v46 }
  0xa9   :  { %1659 = vmatmul.mubr.msk.f32.vlgmr.msra.gmra.mrb[2].mxu1 %vm67_vm0, %v56_v19  ;;  %1764 = vmatprep.subr.bf16.mxu0 %v1763_v45 }
  0xaa   :  { %1674 = vmatprep.mubr.msk.f32.mxu1 %vm1960_vm1, %v1959_v20  ;;  %1766 = vmatpush3.bf16.msra.mxu0 %v1763_v45  ;;  %v269_v50 = vsel %vm67_vm0, %v1824_v48, %v1825_v47 }
  0xab   :  { %v1767_v51 = vpack.c.bf16 %v269_v50, %v268_v49 }
  0xad   :  { %1768 = vmatprep.subr.bf16.mxu0 %v1767_v51 }
  0xae   :  { %1770 = vmatpush3.bf16.msra.mxu0 %v1767_v51 }
  0xaf   :  { %1682 = vmatprep.subr.mxu0 %v1959_v20 }
  0xb1   :  { %1670 = vmatmul.mubr.msk.f32.vlgmr.msra.gmra.mrb[0].mxu0 %vm67_vm0, %v58_v52 }
  0xb2   :  { %1684 = vmatprep.mubr.msk.f32.mxu0 %vm1960_vm1, %v1959_v20 }
 0x106   :  { %v2065_v21 = vpop.f32.mrb[0].mxu1 }
 0x107   :  { %v2073_v24 = vpop.f32.mrb[1].mxu1 }
 0x17c   :  { %v2085_v31 = vpop.f32.mrb[2].mxu1 }
 0x17d   :  { %v2087_v32 = vpop.f32.mrb[3].mxu1 }
 0x17e   :  { %1673 = vmatpush3.xpose.msk.msra.mxu1 %vm355_vm2, %v2087_v32 }
 0x17f   :  { %1677 = vmatprep.subr.mxu1 %v1959_v20 }
 0x181   :  { %1675 = vmatmul.mubr.msk.f32.vlgmr.msra.gmra.mrb[4].mxu1 %vm355_vm2, %v2073_v24 }
 0x182   :  { %1678 = vmatpush3.xpose.msk.msra.mxu1 %vm355_vm2, %v2085_v31  ;;  %1679 = vmatprep.mubr.msk.f32.mxu1 %vm1960_vm1, %v1959_v20 }
 0x183   :  { %1687 = vmatprep.subr.mxu1 %v1959_v20 }
 0x184   :  { %v2128_v8 = vpop.f32.mrb[0].mxu0 }
 0x185   :  { %1680 = vmatmul.mubr.msk.f32.vlgmr.msra.gmra.mrb[6].mxu1 %vm355_vm2, %v2065_v21  ;;  %v2130_v10 = vpop.f32.mrb[1].mxu0 }
 0x186   :  { %1689 = vmatprep.mubr.msk.f32.mxu1 %vm1960_vm1, %v1959_v20  ;;  %1688 = vmatpush3.msra.mxu1 %v2128_v8 }
 0x187   :  { %1683 = vmatpush3.msra.mxu0 %v2130_v10  ;;  %1697 = vmatprep.subr.mxu1 %v1959_v20 }
 0x188   :  { %1692 = vmatprep.subr.mxu0 %v1959_v20 }
 0x254   :  { %v428_v53 = vpop.f32.mrb[4].mxu1 }
 0x255   :  { %v508_v54 = vmul.f32 0.25, %v428_v53  ;;  %v1676_v55 = vpop.f32.mrb[5].mxu1 }
 0x257   :  { %v511_v56 = vsel %vm510_vm3, %v508_v54, -inf }
 0x258   :  { %512 = vmax.xlane.f32.xlu0 %v511_v56  ;;  %v504_v57 = vpop.f32.mrb[6].mxu1 }
 0x259   :  { %v509_v58 = vmul.f32 0.25, %v504_v57  ;;  %v1681_v59 = vpop.f32.mrb[7].mxu1 }
 0x25b   :  { %v514_v60 = vsel %vm510_vm3, %v509_v58, -inf }
 0x25c   :  { %515 = vmax.xlane.f32.xlu1 %v514_v60 }
 0x26d   :  { %683 = vrot.lane.b32.xlu1 %v2087_v32, %s1962_s2 }
 0x271   :  { %681 = vrot.lane.b32.xlu1 %v2073_v24, %s1962_s2 }
 0x275   :  { %759 = vrot.lane.b32.xlu1 %v2065_v21, %s1962_s2 }
 0x2e5   :  { %v513_v61 = vpop.xlane.xlu0 %512 }
 0x2e6   :  { %v517_v62 = vsub.f32 %v508_v54, %v513_v61 }
 0x2e8   :  { %v519_v63 = vmul.f32 1.442695, %v517_v62 }
 0x2e9   :  { %v516_v0 = vpop.xlane.xlu1 %515 }
 0x2ea   :  { %1826 = vpow2.f32 %v519_v63  ;;  %v518_v1 = vsub.f32 %v509_v58, %v516_v0 }
 0x2ec   :  { %v521_v2 = vmul.f32 1.442695, %v518_v1 }
 0x2ed   :  { %v684_v13 = vpop.permute.xlu1 %683 }
 0x2ee   :  { %1828 = vpow2.f32 %v521_v2 }
 0x2f1   :  { %v682_v17 = vpop.permute.xlu1 %681 }
 0x2f4   :  { %v1827_v3 = vpop.eup %1826 }
 0x2f5   :  { %v523_v4 = vsel %vm510_vm3, %v1827_v3, 0.0  ;;  %v760_v22 = vpop.permute.xlu1 %759 }
 0x2f6   :  { %524 = vadd.xlane.f32.xlu0 %v523_v4 }
 0x2f8   :  { %v1829_v5 = vpop.eup %1828 }
 0x2f9   :  { %v526_v7 = vsel %vm510_vm3, %v1829_v5, 0.0 }
 0x2fa   :  { %527 = vadd.xlane.f32.xlu0 %v526_v7 }
 0x310   :  { %761 = vrot.lane.b32.xlu0 %v2085_v31, %s1962_s2 }
 0x383   :  { %v525_v11 = vpop.xlane.xlu0 %524 }
 0x384   :  { %1830 = vrcp.f32 %v525_v11 }
 0x387   :  { %v528_v12 = vpop.xlane.xlu0 %527 }
 0x388   :  { %1832 = vrcp.f32 %v528_v12 }
 0x38b   :  { %v762_v19 = vpop.permute.xlu0 %761 }
 0x38e   :  { %v1831_v14 = vpop.eup %1830 }
 0x38f   :  { %v530_v15 = vmul.f32 %v1831_v14, %v1827_v3 }
 0x391   :  { %533 = vst.msk [vmem:[#allocation8] sm:$0xff] %vm510_vm3, %v530_v15  ;;  %1685 = vmatmul.mubr.msk.f32.vlgmr.msra.gmra.mrb[2].mxu0 %vm510_vm3, %v530_v15 }
 0x392   :  { %v1833_v16 = vpop.eup %1832  ;;  %1693 = vmatpush3.xpose.msk.msra.mxu0 %vm355_vm2, %v684_v13  ;;  %1694 = vmatprep.mubr.msk.f32.mxu0 %vm1960_vm1, %v1959_v20 }
 0x393   :  { %v532_v18 = vmul.f32 %v1833_v16, %v1829_v5  ;;  %1702 = vmatprep.subr.mxu0 %v1959_v20 }
 0x395   :  { %534 = vst.msk [vmem:[#allocation8 + $0x8] sm:$0xff] %vm510_vm3, %v532_v18  ;;  %1690 = vmatmul.mubr.msk.f32.vlgmr.msra.gmra.mrb[8].mxu1 %vm510_vm3, %v532_v18  ;;  %1695 = vmatmul.mubr.msk.f32.vlgmr.msra.gmra.mrb[4].mxu0 %vm355_vm2, %v682_v17 }
 0x396   :  { %1698 = vmatpush3.xpose.msk.msra.mxu1 %vm355_vm2, %v762_v19  ;;  %1699 = vmatprep.mubr.msk.f32.mxu1 %vm1960_vm1, %v1959_v20 }
 0x397   :  { %1707 = vmatprep.subr.mxu1 %v1959_v20  ;;  %1704 = vmatprep.mubr.msk.f32.mxu0 %vm1960_vm1, %v1959_v20 }
 0x399   :  { %1700 = vmatmul.mubr.msk.f32.vlgmr.msra.gmra.mrb[10].mxu1 %vm355_vm2, %v760_v22 }
 0x39a   :  { %1709 = vmatprep.mubr.msk.f32.mxu1 %vm1960_vm1, %v1959_v20 }
 0x464   :  { %v2156_v23 = vpop.f32.mrb[2].mxu0 }
 0x465   :  { %v1686_v25 = vpop.f32.mrb[3].mxu0 }
 0x468   :  { %v2158_v26 = vpop.f32.mrb[8].mxu1  ;;  %v755_v27 = vpop.f32.mrb[4].mxu0 }
 0x469   :  { %v837_v28 = vmul.f32 0.25, %v755_v27  ;;  %v1691_v29 = vpop.f32.mrb[9].mxu1  ;;  %v1696_v30 = vpop.f32.mrb[5].mxu0 }
 0x46a   :  { %v1377_v29 = vld [vmem:[%s2276_s4 + $0x8] sm:$0xff]  ;;  %v1378_v30 = vld [vmem:[%s2276_s4 + $0x10] sm:$0xff] }
 0x46b   :  { %v839_v33 = vsel %vm510_vm3, %v837_v28, -inf }
 0x46c   :  { %840 = vmax.xlane.f32.xlu0 %v839_v33  ;;  %v833_v34 = vpop.f32.mrb[10].mxu1 }
 0x46d   :  { %v838_v35 = vmul.f32 0.25, %v833_v34  ;;  %v1701_v36 = vpop.f32.mrb[11].mxu1  ;;  %v1379_v34 = vld [vmem:[%s2276_s4 + $0x18] sm:$0xff] }
 0x46e   :  { %v1380_v36 = vld [vmem:[%s2276_s4 + $0x20] sm:$0xff] }
 0x46f   :  { %v842_v37 = vsel %vm510_vm3, %v838_v35, -inf }
 0x470   :  { %843 = vmax.xlane.f32.xlu1 %v842_v37  ;;  %v1381_v37 = vld [vmem:[%s2276_s4 + $0x28] sm:$0xff] }
 0x481   :  { %865 = vrot.lane.b32.xlu1 %v2130_v10, %s1962_s2 }
 0x482   :  { %942 = vrot.lane.b32.xlu0 %v2128_v8, %s1962_s2 }
 0x485   :  { %1020 = vrot.lane.b32.xlu1 %v2087_v32, %s1963_s27 }
 0x489   :  { %1098 = vrot.lane.b32.xlu1 %v2085_v31, %s1963_s27 }
 0x48d   :  { %1096 = vrot.lane.b32.xlu1 %v2065_v21, %s1963_s27 }
 0x4f9   :  { %v841_v38 = vpop.xlane.xlu0 %840 }
 0x4fa   :  { %v845_v39 = vsub.f32 %v837_v28, %v841_v38  ;;  %v1779_v38 = vpack.c.bf16 %v1381_v37, %v1380_v36 }
 0x4fc   :  { %v847_v40 = vmul.f32 1.442695, %v845_v39 }
 0x4fd   :  { %v943_v41 = vpop.permute.xlu0 %942  ;;  %v844_v42 = vpop.xlane.xlu1 %843 }
 0x4fe   :  { %1834 = vpow2.f32 %v847_v40  ;;  %v846_v43 = vsub.f32 %v838_v35, %v844_v42  ;;  %1708 = vmatpush3.msra.mxu1 %v943_v41  ;;  %v1775_v35 = vpack.c.bf16 %v1379_v34, %v1378_v30 }
 0x4ff   :  { %1717 = vmatprep.subr.mxu1 %v1959_v20 }
 0x500   :  { %v849_v44 = vmul.f32 1.442695, %v846_v43 }
 0x501   :  { %v866_v45 = vpop.permute.xlu1 %865 }
 0x502   :  { %1836 = vpow2.f32 %v849_v44  ;;  %1703 = vmatpush3.msra.mxu0 %v866_v45 }
 0x503   :  { %1712 = vmatprep.subr.mxu0 %v1959_v20 }
 0x505   :  { %v1021_v49 = vpop.permute.xlu1 %1020 }
 0x508   :  { %v1835_v31 = vpop.eup %1834 }
 0x509   :  { %v851_v32 = vsel %vm510_vm3, %v1835_v31, 0.0  ;;  %v1099_v53 = vpop.permute.xlu1 %1098 }
 0x50a   :  { %852 = vadd.xlane.f32.xlu0 %v851_v32 }
 0x50c   :  { %v1837_v21 = vpop.eup %1836 }
 0x50d   :  { %v854_v46 = vsel %vm510_vm3, %v1837_v21, 0.0  ;;  %v1097_v55 = vpop.permute.xlu1 %1096 }
 0x50e   :  { %855 = vadd.xlane.f32.xlu0 %v854_v46 }
 0x524   :  { %1018 = vrot.lane.b32.xlu0 %v2073_v24, %s1963_s27 }
 0x597   :  { %v853_v47 = vpop.xlane.xlu0 %852 }
 0x598   :  { %1838 = vrcp.f32 %v853_v47 }
 0x59b   :  { %v856_v48 = vpop.xlane.xlu0 %855 }
 0x59c   :  { %1840 = vrcp.f32 %v856_v48  ;;  %v1584_v48 = vld [vmem:[#allocation5] ss:$0 sm:$0xff] }
 0x59f   :  { %v1019_v24 = vpop.permute.xlu0 %1018 }
 0x5a2   :  { %v1839_v50 = vpop.eup %1838 }
 0x5a3   :  { %v858_v51 = vmul.f32 %v1839_v50, %v1835_v31 }
 0x5a5   :  { %862 = vst.msk [vmem:[#allocation8 + $0x10] sm:$0xff] %vm510_vm3, %v858_v51  ;;  %1705 = vmatmul.mubr.msk.f32.vlgmr.msra.gmra.mrb[6].mxu0 %vm510_vm3, %v858_v51 }
 0x5a6   :  { %v1841_v52 = vpop.eup %1840  ;;  %1713 = vmatpush3.xpose.msk.msra.mxu0 %vm355_vm2, %v1021_v49  ;;  %1714 = vmatprep.mubr.msk.f32.mxu0 %vm1960_vm1, %v1959_v20 }
 0x5a7   :  { %v860_v54 = vmul.f32 %v1841_v52, %v1837_v21  ;;  %1722 = vmatprep.subr.mxu0 %v1959_v20 }
 0x5a9   :  { %863 = vst.msk [vmem:[#allocation8 + $0x18] sm:$0xff] %vm510_vm3, %v860_v54  ;;  %1710 = vmatmul.mubr.msk.f32.vlgmr.msra.gmra.mrb[12].mxu1 %vm510_vm3, %v860_v54  ;;  %1715 = vmatmul.mubr.msk.f32.vlgmr.msra.gmra.mrb[8].mxu0 %vm355_vm2, %v1019_v24 }
 0x5aa   :  { %1718 = vmatpush3.xpose.msk.msra.mxu1 %vm355_vm2, %v1099_v53  ;;  %1719 = vmatprep.mubr.msk.f32.mxu1 %vm1960_vm1, %v1959_v20 }
 0x5ab   :  { %1727 = vmatprep.subr.mxu1 %v1959_v20  ;;  %1724 = vmatprep.mubr.msk.f32.mxu0 %vm1960_vm1, %v1959_v20 }
 0x5ad   :  { %1720 = vmatmul.mubr.msk.f32.vlgmr.msra.gmra.mrb[14].mxu1 %vm355_vm2, %v1097_v55 }
 0x5ae   :  { %1729 = vmatprep.mubr.msk.f32.mxu1 %vm1960_vm1, %v1959_v20 }
 0x678   :  { %v937_v56 = vpop.f32.mrb[6].mxu0 }
 0x679   :  { %v1706_v57 = vpop.f32.mrb[7].mxu0 }
 0x67c   :  { %v1014_v58 = vpop.f32.mrb[12].mxu1  ;;  %v1092_v59 = vpop.f32.mrb[8].mxu0 }
 0x67d   :  { %v1174_v60 = vmul.f32 0.25, %v1092_v59  ;;  %v1711_v61 = vpop.f32.mrb[13].mxu1  ;;  %v1716_v62 = vpop.f32.mrb[9].mxu0 }
 0x67f   :  { %v1176_v63 = vsel %vm510_vm3, %v1174_v60, -inf }
 0x680   :  { %1177 = vmax.xlane.f32.xlu0 %v1176_v63  ;;  %v1170_v0 = vpop.f32.mrb[14].mxu1 }
 0x681   :  { %v1175_v1 = vmul.f32 0.25, %v1170_v0  ;;  %v1721_v2 = vpop.f32.mrb[15].mxu1 }
 0x683   :  { %v1179_v3 = vsel %vm510_vm3, %v1175_v1, -inf }
 0x684   :  { %1180 = vmax.xlane.f32.xlu1 %v1179_v3 }
 0x695   :  { %1201 = vrot.lane.b32.xlu1 %v2130_v10, %s1963_s27 }
 0x699   :  { %1355 = vrot.lane.b32.xlu1 %v937_v56, %s1964_s28 }
 0x69d   :  { %1357 = vrot.lane.b32.xlu1 %v1014_v58, %s1964_s28 }
 0x70d   :  { %v1178_v20 = vpop.xlane.xlu0 %1177 }
 0x70e   :  { %v1182_v4 = vsub.f32 %v1174_v60, %v1178_v20 }
 0x710   :  { %v1184_v5 = vmul.f32 1.442695, %v1182_v4 }
 0x711   :  { %v1181_v7 = vpop.xlane.xlu1 %1180 }
 0x712   :  { %1842 = vpow2.f32 %v1184_v5  ;;  %v1183_v11 = vsub.f32 %v1175_v1, %v1181_v7 }
 0x714   :  { %v1186_v12 = vmul.f32 1.442695, %v1183_v11 }
 0x715   :  { %v1202_v13 = vpop.permute.xlu1 %1201 }
 0x716   :  { %1844 = vpow2.f32 %v1186_v12  ;;  %1723 = vmatpush3.msra.mxu0 %v1202_v13 }
 0x719   :  { %v1356_v43 = vpop.permute.xlu1 %1355 }
 0x71a   :  { %v1369_v44 = vsel %vm355_vm2, %v2156_v23, %v1356_v43 }
 0x71c   :  { %v1843_v14 = vpop.eup %1842 }
 0x71d   :  { %v1188_v15 = vsel %vm510_vm3, %v1843_v14, 0.0  ;;  %v1358_v45 = vpop.permute.xlu1 %1357 }
 0x71e   :  { %1189 = vadd.xlane.f32.xlu0 %v1188_v15  ;;  %v1370_v21 = vsel %vm355_vm2, %v2158_v26, %v1358_v45 }
 0x720   :  { %v1845_v16 = vpop.eup %1844 }
 0x721   :  { %v1191_v10 = vsel %vm510_vm3, %v1845_v16, 0.0 }
 0x722   :  { %1192 = vadd.xlane.f32.xlu0 %v1191_v10 }
 0x738   :  { %1277 = vrot.lane.b32.xlu0 %v2128_v8, %s1963_s27  ;;  %v1376_v8 = vld [vmem:[%s2276_s4] sm:$0xff]  ;;  %s1965_s4 = smov [#allocation8]  }
 0x739   :  { %v1771_v33 = vpack.c.bf16 %v1377_v29, %v1376_v8  ;;  %s1543_s18 = sshll.u32 %s1965_s4, 4  ;;  %s1544_s18 = int_to_ptr.vmem [resolvable:$true] %s1543_s18 }
 0x73a   :  { %s1902_s19 = scalar_lea.vmem %s1544_s18, 768  ;;  %p1907_p3 = scmp.lt.s32.totalorder %s1544_s18, %s1544_s18 }
 0x73b   :  { %1772 = vmatprep.subr.bf16.mxu0 %v1771_v33  ;;  %p1903_p2 = scmp.ne.s32.totalorder %s1544_s18, %s1902_s19  ;;  %p1908_p4 = scmp.lt.s32.totalorder %s1902_s19, %s1902_s19 }
 0x73d   :  { %p1909_p5 = por %p1908_p4, %p1907_p3 }
 0x73f   :  { %p1910_p6 = pnand %p1909_p5, %p1903_p2 }
 0x7ab   :  { %v1190_v17 = vpop.xlane.xlu0 %1189 }
 0x7ac   :  { %1846 = vrcp.f32 %v1190_v17 }
 0x7af   :  { %v1193_v18 = vpop.xlane.xlu0 %1192 }
 0x7b0   :  { %1848 = vrcp.f32 %v1193_v18 }
 0x7b3   :  { %v1278_v19 = vpop.permute.xlu0 %1277 }
 0x7b4   :  { %1728 = vmatpush3.msra.mxu1 %v1278_v19 }
 0x7b6   :  { %v1847_v22 = vpop.eup %1846 }
 0x7b7   :  { %v1195_v25 = vmul.f32 %v1847_v22, %v1843_v14 }
 0x7b9   :  { %1199 = vst.msk [vmem:[#allocation8 + $0x20] sm:$0xff] %vm510_vm3, %v1195_v25  ;;  %1725 = vmatmul.mubr.msk.f32.vlgmr.msra.gmra.mrb[10].mxu0 %vm510_vm3, %v1195_v25 }
 0x7ba   :  { %v1849_v27 = vpop.eup %1848  ;;  %1774 = vmatpush3.bf16.msra.mxu0 %v1771_v33 }
 0x7bb   :  { %v1197_v28 = vmul.f32 %v1849_v27, %v1845_v16  ;;  %1776 = vmatprep.subr.bf16.mxu0 %v1775_v35 }
 0x7bd   :  { %1200 = vst.msk [vmem:[#allocation8 + $0x28] sm:$0xff] %vm510_vm3, %v1197_v28  ;;  %1730 = vmatmul.mubr.msk.f32.vlgmr.msra.gmra.mrb[16].mxu1 %vm510_vm3, %v1197_v28 }
 0x7be   :  { %1778 = vmatpush3.bf16.msra.mxu0 %v1775_v35 }
 0x7bf   :  { %1780 = vmatprep.subr.bf16.mxu0 %v1779_v38 }
 0x7c2   :  { %1782 = vmatpush3.bf16.msra.mxu0 %v1779_v38 }
 0x88c   :  { %v1273_v39 = vpop.f32.mrb[10].mxu0 }
 0x88d   :  { %1363 = vrot.lane.b32.xlu0 %v1273_v39, %s1961_s22  ;;  %v1726_v40 = vpop.f32.mrb[11].mxu0 }
 0x890   :  { %v1349_v41 = vpop.f32.mrb[16].mxu1 }
 0x891   :  { %1365 = vrot.lane.b32.xlu1 %v1349_v41, %s1961_s22  ;;  %v1731_v42 = vpop.f32.mrb[17].mxu1 }
 0x8ff   :  { %v1364_v31 = vpop.permute.xlu0 %1363 }
 0x900   :  { %v1371_v32 = vsel %vm67_vm0, %v1369_v44, %v1364_v31 }
 0x901   :  { %1744 = vmatprep.mubr.msk.f32.mxu0 %vm1386_vm4, %v1371_v32 }
 0x903   :  { %v1366_v46 = vpop.permute.xlu1 %1365 }
 0x904   :  { %v1372_v47 = vsel %vm67_vm0, %v1370_v21, %v1366_v46 }
 0x905   :  { %1745 = vmatmul.mubr.msk.f32.vlgmr.msra.gmra.mrb[12].mxu0 %vm1386_vm4, %v1372_v47 }
 0x9d8   :  { %v1746_v49 = vpop.f32.mrb[12].mxu0 }
 0x9d9   :  { %v1465_v50 = vadd.f32 %v1746_v49, %v1584_v48  ;;  %v1459_v51 = vpop.f32.mrb[13].mxu0 }
 0x9da   :  { %v1460_v52 = vadd.f32 %v1584_v48, %v1459_v51 }
 0x9db   :  { %v1469_v53 = vadd.f32 %v1465_v50, %v2056_v9 }
 0x9dc   :  { %v1468_v23 = vadd.f32 %v1460_v52, %v2049_v6 }
 0x9dd   :  { %v1473_v54 = vsel %vm67_vm0, %v1469_v53, 0.0 }
 0x9de   :  { %1474 = vadd.xlane.f32.xlu1 %v1473_v54  ;;  %v1470_v24 = vsel %vm67_vm0, %v1468_v23, 0.0 }
 0x9df   :  { %1471 = vadd.xlane.f32.xlu0 %v1470_v24 }
 0xa6b   :  { %v1475_v26 = vpop.xlane.xlu1 %1474 }
 0xa6c   :  { %v1478_v55 = vmul.f32 0.03125, %v1475_v26  ;;  %v1472_v56 = vpop.xlane.xlu0 %1471 }
 0xa6d   :  { %v1477_v57 = vmul.f32 0.03125, %v1472_v56 }
 0xa6e   :  { %v1480_v58 = vsub.f32 %v1469_v53, %v1478_v55 }
 0xa6f   :  { %v1479_v59 = vsub.f32 %v1468_v23, %v1477_v57 }
 0xa70   :  { %v1482_v62 = vmul.f32 %v1480_v58, %v1480_v58 }
 0xa71   :  { %v1481_v60 = vmul.f32 %v1479_v59, %v1479_v59 }
 0xa72   :  { %v1486_v9 = vsel %vm67_vm0, %v1482_v62, 0.0 }
 0xa73   :  { %v1483_v61 = vsel %vm67_vm0, %v1481_v60, 0.0 }
 0xa74   :  { %1484 = vadd.xlane.f32.xlu0 %v1483_v61 }
 0xa78   :  { %1487 = vadd.xlane.f32.xlu0 %v1486_v9 }
 0xa79   :  { %1913 = shalt.err (!%p1910_p6)
}
 0xa7a   :  { %s1914_s22 = scalar_lea.hbm %s2279_s7, 768 }
 0xa7b   :  { %p1915_p7 = scmp.ne.s32.totalorder %s2279_s7, %s1914_s22  ;;  %p1918_p8 = scmp.lt.u32.totalorder %s1914_s22, %s2279_s7 }
 0xa7d   :  { %p1920_p9 = pnand %p1918_p8, %p1915_p7 }
 0xa7f   :  { %1923 = shalt.err (!%p1920_p9)
}
 0xa80   :  { %1549 = dma.vmem_to_hbm [thread:$0]  %s1544_s18, 768, %s2279_s7, [#allocation9], %s1955_s11, %s1955_s11, %s1956_s12   ;;  %v1587_v17 = vld [vmem:[#allocation5 + $0x1] ss:$0 sm:$0xff]  ;;  %v1588_v19 = vld [vmem:[#allocation5 + $0x2] ss:$0 sm:$0xff] }
 0xa81   :  { %s1966_s7 = smov [#allocation7]  }
 0xa82   :  { %s1531_s2 = sshll.u32 %s1966_s7, 4  ;;  %s1532_s2 = int_to_ptr.vmem [resolvable:$true] %s1531_s2 }
 0xa83   :  { %s1924_s27 = scalar_lea.vmem %s1532_s2, 256  ;;  %p1929_p11 = scmp.lt.s32.totalorder %s1532_s2, %s1532_s2 }
 0xa84   :  { %p1925_p10 = scmp.ne.s32.totalorder %s1532_s2, %s1924_s27  ;;  %p1930_p12 = scmp.lt.s32.totalorder %s1924_s27, %s1924_s27 }
 0xa86   :  { %p1931_p13 = por %p1930_p12, %p1929_p11 }
 0xa88   :  { %p1932_p0 = pnand %p1931_p13, %p1925_p10 }
 0xb01   :  { %v1485_v6 = vpop.xlane.xlu0 %1484 }
 0xb02   :  { %v1490_v63 = vmul.f32 0.032258064, %v1485_v6 }
 0xb04   :  { %1850 = vrsqrt.f32 %v1490_v63  ;;  %vm1494_vm5 = vcmp.eq.f32.partialorder %v1490_v63, inf  ;;  %v1497_v20 = vand.u32 2147483648, %v1490_v63  ;;  %vm1496_vm6 = vcmp.eq.f32.partialorder %v1490_v63, 0.0 }
 0xb05   :  { %v1488_v0 = vpop.xlane.xlu0 %1487 }
 0xb06   :  { %v1491_v1 = vmul.f32 0.032258064, %v1488_v0 }
 0xb08   :  { %1852 = vrsqrt.f32 %v1491_v1  ;;  %vm1501_vm7 = vcmp.eq.f32.partialorder %v1491_v1, inf  ;;  %v1504_v13 = vand.u32 2147483648, %v1491_v1  ;;  %vm1503_vm8 = vcmp.eq.f32.partialorder %v1491_v1, 0.0 }
 0xb0e   :  { %v1851_v2 = vpop.eup %1850 }
 0xb0f   :  { %v1493_v3 = vmul.f32 %v1851_v2, %v1490_v63 }
 0xb11   :  { %v1495_v4 = vsel %vm1494_vm5, %v1490_v63, %v1493_v3 }
 0xb12   :  { %v1853_v5 = vpop.eup %1852  ;;  %v1498_v7 = vsel %vm1496_vm6, %v1497_v20, %v1495_v4 }
 0xb13   :  { %v1506_v11 = vadd.f32 0.001, %v1498_v7  ;;  %v1500_v12 = vmul.f32 %v1853_v5, %v1491_v1 }
 0xb15   :  { %1854 = vrcp.f32 %v1506_v11  ;;  %v1502_v14 = vsel %vm1501_vm7, %v1491_v1, %v1500_v12 }
 0xb16   :  { %v1505_v15 = vsel %vm1503_vm8, %v1504_v13, %v1502_v14 }
 0xb17   :  { %v1507_v16 = vadd.f32 0.001, %v1505_v15 }
 0xb19   :  { %1856 = vrcp.f32 %v1507_v16 }
 0xb1f   :  { %v1855_v10 = vpop.eup %1854 }
 0xb20   :  { %v1509_v18 = vmul.f32 %v1855_v10, %v1479_v59 }
 0xb22   :  { %v1516_v22 = vmul.f32 %v1587_v17, %v1509_v18 }
 0xb23   :  { %v1857_v25 = vpop.eup %1856 }
 0xb24   :  { %v1511_v27 = vmul.f32 %v1857_v25, %v1480_v58  ;;  %v1522_v28 = vadd.f32 %v1588_v19, %v1516_v22 }
 0xb26   :  { %v1517_v8 = vmul.f32 %v1587_v17, %v1511_v27  ;;  %1524 = vst.msk [vmem:[#allocation7] sm:$0xff] %vm67_vm0, %v1522_v28 }
 0xb28   :  { %v1523_v29 = vadd.f32 %v1588_v19, %v1517_v8 }
 0xb2a   :  { %1525 = vst.msk [vmem:[#allocation7 + $0x8] sm:$0xff] %vm67_vm0, %v1523_v29 }
 0xb2b   :  { %1935 = shalt.err (!%p1932_p0)
}
 0xb2c   :  { %s1936_s30 = scalar_lea.hbm %s2278_s6, 256 }
 0xb2d   :  { %p1937_p1 = scmp.ne.s32.totalorder %s2278_s6, %s1936_s30  ;;  %p1940_p2 = scmp.lt.u32.totalorder %s1936_s30, %s2278_s6 }
 0xb2f   :  { %p1942_p3 = pnand %p1940_p2, %p1937_p1 }
 0xb31   :  { %1945 = shalt.err (!%p1942_p3)
}
 0xb32   :  { %1537 = dma.vmem_to_hbm [thread:$0]  %s1532_s2, 256, %s2278_s6, [#allocation4], %s1955_s11, %s1955_s11, %s1956_s12  }
 0xb33   :  { %1950 = dma.done.wait [#allocation4], 256  }
 0xb34   :  { %1951 = vsyncadd [#allocation4], 4294967040 }
 0xb35   :  { %1952 = dma.done.wait [#allocation9], 768  }
 0xb36   :  { %1953 = vsyncadd [#allocation9], 4294966528 }
 0xb37   :  { %1556 = vsyncpa [#allocation3], 1 }
 0xb38   :  { %1557 = vsyncpa [#allocation6], 1 }
 0xb39   :  { %1558 = vsyncpa [#allocation4], 1 }
 0xb3a   :  { %1559 = vsyncpa [#allocation9], 1 }

</bundles_post_ra>
